<compile_context>
chip_gen: v5e
topology: v5e:2x2
jax: 0.10.0
libtpu: 0.0.40
codegen_flags: <defaults>
</compile_context>

<pallas_src>
import jax
import jax.numpy as jnp
from jax.experimental import pallas as pl
from jax.experimental.pallas import tpu as pltpu

_MiB = 1024 * 1024


def _pool_fc_epilogue(pooled_sum_f32, w_ref, b_ref, o_ref):
    # 1/HW is already folded into w, so pooled_sum (not mean) feeds the matmul.
    # Cast the tiny [TB, C] operand to the weight dtype instead of upcasting the
    # weight; MXU accumulates in f32 via preferred_element_type.
    pooled = pooled_sum_f32.astype(w_ref.dtype)
    out = jnp.dot(pooled, w_ref[...], preferred_element_type=jnp.float32)
    out = out + b_ref[...].astype(jnp.float32)
    o_ref[...] = out.astype(o_ref.dtype)


def _classifier_head_kernel_direct(x_ref, w_ref, b_ref, o_ref, acc_ref):
    # x_ref:  [TB, C, THW]  (NCHW kept; spatial flattened onto the lane axis)
    # w_ref:  [C, Np]       (resident; already scaled by 1/HW)
    # b_ref:  [1, Np]       (resident)
    # o_ref:  [TB, Np]
    # acc_ref:[TB, C] f32   (persists across the spatial reduction axis)
    hw = pl.program_id(1)

    @pl.when(hw == 0)
    def _():
        acc_ref[...] = jnp.zeros_like(acc_ref)

    # Per-step cross-lane reduce: only used when THW >= 512 or there is a single
    # spatial step, so the within-vreg XLU collapse is well amortized.
    acc_ref[...] += jnp.sum(x_ref[...], axis=-1, dtype=jnp.float32)

    @pl.when(hw == pl.num_programs(1) - 1)
    def _():
        _pool_fc_epilogue(acc_ref[...], w_ref, b_ref, o_ref)


def _classifier_head_kernel_lanewise(x_ref, w_ref, b_ref, o_ref, acc_ref):
    # Same as above, but acc_ref is [TB, C, THW] f32: per-step accumulation is a
    # pure VALU add; the single cross-lane (XLU) collapse happens once at the end.
    hw = pl.program_id(1)

    @pl.when(hw == 0)
    def _():
        acc_ref[...] = jnp.zeros_like(acc_ref)

    acc_ref[...] += x_ref[...].astype(jnp.float32)

    @pl.when(hw == pl.num_programs(1) - 1)
    def _():
        _pool_fc_epilogue(jnp.sum(acc_ref[...], axis=-1), w_ref, b_ref, o_ref)


def classifier_head(x_nchw, fc_weight, fc_bias, *, hw_tile=None, batch_tile=None):
    """x_nchw: [B, C, H, W]; fc_weight: [N, C] (PyTorch layout); fc_bias: [N]."""
    B, C, H, W = x_nchw.shape
    N, C_w = fc_weight.shape
    assert C_w == C, "fc_weight second dim must equal channel count"
    HW = H * W
    out_dtype = x_nchw.dtype
    itemsize = jnp.dtype(x_nchw.dtype).itemsize
    out_itemsize = jnp.dtype(out_dtype).itemsize

    # ---- generation-aware VMEM budgets -------------------------------------
    try:
        vmem_cap = int(pltpu.get_tpu_info().vmem_capacity_bytes)
    except Exception:
        vmem_cap = 64 * _MiB  # conservative (v7x-sized) fallback
    vmem_cap_limit = max(32 * _MiB, vmem_cap - 16 * _MiB)   # leave compiler headroom
    buf_budget = max(4 * _MiB, min(12 * _MiB, vmem_cap // 10))
    tb_target = 128 if vmem_cap >= 96 * _MiB else 64

    # ---- weight / bias prep: pad class dim to lane-dense 128, fold 1/HW ----
    Np = ((N + 127) // 128) * 128
    w = (fc_weight.T.astype(jnp.float32) * (1.0 / HW)).astype(fc_weight.dtype)
    w = jnp.pad(w, ((0, 0), (0, Np - N)))                   # [C, Np]
    b = jnp.pad(fc_bias, (0, Np - N)).reshape(1, Np)        # [1, Np]

    # ---- batch padding: TB is the output's second-to-last dim --------------
    sub = {4: 8, 2: 16, 1: 32}.get(out_itemsize, 8)
    Bp = ((B + sub - 1) // sub) * sub
    x = x_nchw.reshape(B, C, HW)                             # free reshape, no HBM transpose
    if Bp != B:
        x = jnp.pad(x, ((0, Bp - B), (0, 0), (0, 0)))

    # ---- spatial (lane) tile candidates: multiple of 128, or full extent ---
    if hw_tile is not None:
        if HW % hw_tile != 0 or (hw_tile != HW and hw_tile % 128 != 0):
            raise ValueError("hw_tile must divide H*W and be a multiple of 128 (or equal H*W)")
        thw_cands = [hw_tile]
    elif HW % 128 == 0:
        thw_cands = list(dict.fromkeys(
            t for t in (HW, 2048, 1024, 512, 256, 128) if t <= HW and HW % t == 0))
    else:
        thw_cands = [HW]

    # ---- batch tile candidates (keep >= 2 parallel tiles when possible) ----
    if batch_tile is not None:
        if Bp % batch_tile != 0 or (batch_tile % sub != 0 and batch_tile != Bp):
            raise ValueError("batch_tile must divide the padded batch and be a multiple of %d" % sub)
        tb_cands = [batch_tile]
    else:
        tb_max = Bp if Bp <= sub else min(tb_target, Bp // 2)
        tb_max = max(tb_max, sub)
        tb_cands = sorted((t for t in range(sub, Bp + 1, sub)
                           if Bp % t == 0 and t <= tb_max), reverse=True)

    # ---- joint (TB, THW) selection ------------------------------------------
    def fits_in(tb, thw):
        return tb * C * thw * itemsize <= buf_budget

    good = [t for t in thw_cands if t == HW or t >= 512]     # direct-reduce friendly
    small = [t for t in thw_cands if not (t == HW or t >= 512)]

    chosen = None
    for tb in tb_cands:                                       # maximize TB first (MXU rows)
        for thw in good:                                      # then largest good THW
            if fits_in(tb, thw):
                chosen = (tb, thw)
                break
        if chosen is not None:
            break
    if chosen is None:                                        # VMEM-tight: small THW + lane-wise acc
        for tb in tb_cands:
            for thw in small:
                if fits_in(tb, thw) and tb * C * thw * 4 <= buf_budget:
                    chosen = (tb, thw)
                    break
            if chosen is not None:
                break
    if chosen is None:                                        # last resort: smallest legal tiles
        chosen = (tb_cands[-1], thw_cands[-1])
    TB, THW = chosen

    grid_b, grid_hw = Bp // TB, HW // THW
    assert Bp % TB == 0 and HW % THW == 0
    grid = (grid_b, grid_hw)

    use_lanewise = (grid_hw > 1) and (THW < 512)

    # ---- VMEM accounting / limit --------------------------------------------
    w_bytes = w.size * jnp.dtype(w.dtype).itemsize
    b_bytes = b.size * jnp.dtype(b.dtype).itemsize
    acc_bytes = TB * C * (THW if use_lanewise else 1) * 4
    need = (2 * TB * C * THW * itemsize       # double-buffered input tiles
            + 2 * w_bytes + 2 * b_bytes       # resident weight/bias (double-buffered by default)
            + 2 * TB * Np * out_itemsize      # output tiles
            + acc_bytes)                      # accumulator scratch
    vmem_limit = int(min(vmem_cap_limit, max(32 * _MiB, need + 8 * _MiB)))

    cost = pl.CostEstimate(
        flops=2 * B * C * N + B * C * HW,     # unpadded class count
        transcendentals=0,
        bytes_accessed=(x.size * itemsize + w_bytes + b_bytes + Bp * Np * out_itemsize),
    )

    kernel = _classifier_head_kernel_lanewise if use_lanewise else _classifier_head_kernel_direct
    acc_shape = (TB, C, THW) if use_lanewise else (TB, C)

    out = pl.pallas_call(
        kernel,
        out_shape=jax.ShapeDtypeStruct((Bp, Np), out_dtype),
        grid=grid,
        in_specs=[
            pl.BlockSpec((TB, C, THW), lambda bi, si: (bi, 0, si)),
            pl.BlockSpec((C, Np), lambda bi, si: (0, 0)),     # resident weight
            pl.BlockSpec((1, Np), lambda bi, si: (0, 0)),     # resident bias
        ],
        out_specs=pl.BlockSpec((TB, Np), lambda bi, si: (bi, 0)),
        scratch_shapes=[pltpu.VMEM(acc_shape, jnp.float32)],
        compiler_params=pltpu.CompilerParams(
            dimension_semantics=("parallel", "arbitrary"),
            vmem_limit_bytes=vmem_limit),
        cost_estimate=cost,
    )(x, w, b)

    return out[:B, :N]


def _reference(x_nchw, fc_weight, fc_bias):
    pooled = jnp.mean(x_nchw.astype(jnp.float32), axis=(2, 3))   # [B, C]
    return pooled @ fc_weight.T.astype(jnp.float32) + fc_bias.astype(jnp.float32)


if __name__ == "__main__":
    key = jax.random.PRNGKey(0)
    k_x, k_w, k_b, k_x2, k_w2, k_b2 = jax.random.split(key, 6)

    # ---- Check 1: small shapes, default tiling (single spatial step, direct path) ----
    B, C, H, W = 2, 4, 16, 16
    num_classes = 8
    x = jax.random.normal(k_x, (B, C, H, W), dtype=jnp.float32)
    fc_weight = jax.random.normal(k_w, (num_classes, C), dtype=jnp.float32) * 0.1
    fc_bias = jax.random.normal(k_b, (num_classes,), dtype=jnp.float32) * 0.1

    out = classifier_head(x, fc_weight, fc_bias)
    jax.block_until_ready(out)
    ref = _reference(x, fc_weight, fc_bias)
    assert out.shape == (B, num_classes)
    assert jnp.allclose(out, ref, atol=1e-4, rtol=1e-4), "mismatch (default tiling)"

    # ---- Check 2: forced small spatial tile -> multi-step lane-wise accumulation path ----
    out2 = classifier_head(x, fc_weight, fc_bias, hw_tile=128)
    jax.block_until_ready(out2)
    assert jnp.allclose(out2, ref, atol=1e-4, rtol=1e-4), "mismatch (lane-wise accumulation)"

    # ---- Check 3: batch tiling (2 parallel batch tiles), non-128 class count, HW not /128 ----
    B3, C3, H3, W3, N3 = 16, 8, 8, 8, 10
    x3 = jax.random.normal(k_x2, (B3, C3, H3, W3), dtype=jnp.float32)
    w3 = jax.random.normal(k_w2, (N3, C3), dtype=jnp.float32) * 0.1
    b3 = jax.random.normal(k_b2, (N3,), dtype=jnp.float32) * 0.1
    out3 = classifier_head(x3, w3, b3)
    jax.block_until_ready(out3)
    ref3 = _reference(x3, w3, b3)
    assert out3.shape == (B3, N3)
    assert jnp.allclose(out3, ref3, atol=1e-4, rtol=1e-4), "mismatch (batch-tiled)"

    print("KERNEL_OK")
</pallas_src>

<mosaic_0001>
module attributes {stable_mosaic.version = 11 : i64} {
  func.func @_classifier_head_kernel_direct(%arg0: i32, %arg1: i32, %arg2: memref<8x4x256xf32, #tpu.memory_space<vmem>>, %arg3: memref<4x128xf32, #tpu.memory_space<vmem>>, %arg4: memref<1x128xf32, #tpu.memory_space<vmem>>, %arg5: memref<8x128xf32, #tpu.memory_space<vmem>>, %arg6: memref<8x4xf32, #tpu.memory_space<vmem>>) attributes {dimension_semantics = [#tpu.dimension_semantics<parallel>, #tpu.dimension_semantics<arbitrary>], iteration_bounds = array<i64: 1, 1>, scalar_prefetch = 0 : i64, scratch_operands = 1 : i64, tpu.core_type = #tpu.core_type<tc>, window_params = [{transform_indices = @transform_0, window_bounds = array<i64: 8, 4, 256>}, {pipeline_mode = #tpu.pipeline_mode<synchronous>, transform_indices = @transform_1, window_bounds = array<i64: 4, 128>}, {pipeline_mode = #tpu.pipeline_mode<synchronous>, transform_indices = @transform_2, window_bounds = array<i64: 1, 128>}, {transform_indices = @transform_3, window_bounds = array<i64: 8, 128>}]} {
    %c0_i32 = arith.constant 0 : i32
    %0 = arith.cmpi eq, %arg1, %c0_i32 : i32
    %1 = arith.extui %0 : i1 to i32
    %c0_i32_0 = arith.constant 0 : i32
    %2 = arith.cmpi ne, %1, %c0_i32_0 : i32
    scf.if %2 {
      %cst_9 = arith.constant 0.000000e+00 : f32
      %11 = vector.broadcast %cst_9 : f32 to vector<8x4xf32>
      %c0_10 = arith.constant 0 : index
      %c0_11 = arith.constant 0 : index
      %12 = vector.load %arg6[%c0_10, %c0_11] : memref<8x4xf32, #tpu.memory_space<vmem>>, vector<8x4xf32>
      tpu.vector_store %arg6[%c0_10, %c0_11], %11 {strides = array<i32>} : memref<8x4xf32, #tpu.memory_space<vmem>>, vector<8x4xf32>,
    } else {
    }
    %c0 = arith.constant 0 : index
    %c0_1 = arith.constant 0 : index
    %3 = vector.load %arg6[%c0, %c0_1] : memref<8x4xf32, #tpu.memory_space<vmem>>, vector<8x4xf32>
    %c0_2 = arith.constant 0 : index
    %c0_3 = arith.constant 0 : index
    %c0_4 = arith.constant 0 : index
    %4 = vector.load %arg2[%c0_2, %c0_3, %c0_4] : memref<8x4x256xf32, #tpu.memory_space<vmem>>, vector<8x4x256xf32>
    %cst = arith.constant dense<0.000000e+00> : vector<8x4xf32>
    %5 = vector.multi_reduction <add>, %4, %cst [2] : vector<8x4x256xf32> to vector<8x4xf32>
    %6 = arith.addf %3, %5 : vector<8x4xf32>
    %c0_5 = arith.constant 0 : index
    %c0_6 = arith.constant 0 : index
    %7 = vector.load %arg6[%c0_5, %c0_6] : memref<8x4xf32, #tpu.memory_space<vmem>>, vector<8x4xf32>
    tpu.vector_store %arg6[%c0_5, %c0_6], %6 {strides = array<i32>} : memref<8x4xf32, #tpu.memory_space<vmem>>, vector<8x4xf32>,
    %c0_i32_7 = arith.constant 0 : i32
    %8 = arith.cmpi eq, %arg1, %c0_i32_7 : i32
    %9 = arith.extui %8 : i1 to i32
    %c0_i32_8 = arith.constant 0 : i32
    %10 = arith.cmpi ne, %9, %c0_i32_8 : i32
    scf.if %10 {
      %c0_9 = arith.constant 0 : index
      %c0_10 = arith.constant 0 : index
      %11 = vector.load %arg6[%c0_9, %c0_10] : memref<8x4xf32, #tpu.memory_space<vmem>>, vector<8x4xf32>
      %c0_11 = arith.constant 0 : index
      %c0_12 = arith.constant 0 : index
      %12 = vector.load %arg3[%c0_11, %c0_12] : memref<4x128xf32, #tpu.memory_space<vmem>>, vector<4x128xf32>
      %cst_13 = arith.constant dense<0.000000e+00> : vector<8x128xf32>
      %13 = tpu.matmul %11, %12, %cst_13 {dimension_numbers = #tpu.dot_dimension_numbers<[1], [0], [0], [1], [0, 0, 1, 1], [], []>} : vector<8x4xf32>, vector<4x128xf32>, vector<8x128xf32> -> vector<8x128xf32>
      %c0_14 = arith.constant 0 : index
      %c0_15 = arith.constant 0 : index
      %14 = vector.load %arg4[%c0_14, %c0_15] : memref<1x128xf32, #tpu.memory_space<vmem>>, vector<1x128xf32>
      %15 = vector.broadcast %14 : vector<1x128xf32> to vector<8x128xf32>
      %16 = arith.addf %13, %15 : vector<8x128xf32>
      %c0_16 = arith.constant 0 : index
      %c0_17 = arith.constant 0 : index
      %17 = vector.load %arg5[%c0_16, %c0_17] : memref<8x128xf32, #tpu.memory_space<vmem>>, vector<8x128xf32>
      tpu.vector_store %arg5[%c0_16, %c0_17], %16 {strides = array<i32>} : memref<8x128xf32, #tpu.memory_space<vmem>>, vector<8x128xf32>,
    } else {
    }
    return
  }
  func.func @transform_0(%arg0: i32, %arg1: i32) -> (i32, i32, i32) {
    %c0_i32 = arith.constant 0 : i32
    %c0_i32_0 = arith.constant 0 : i32
    return %arg0, %c0_i32, %arg1 : i32, i32, i32
  }
  func.func @transform_1(%arg0: i32, %arg1: i32) -> (i32, i32) {
    %c0_i32 = arith.constant 0 : i32
    %c0_i32_0 = arith.constant 0 : i32
    %c0_i32_1 = arith.constant 0 : i32
    return %c0_i32, %c0_i32_0 : i32, i32
  }
  func.func @transform_2(%arg0: i32, %arg1: i32) -> (i32, i32) {
    %c0_i32 = arith.constant 0 : i32
    %c0_i32_0 = arith.constant 0 : i32
    %c0_i32_1 = arith.constant 0 : i32
    return %c0_i32, %c0_i32_0 : i32, i32
  }
  func.func @transform_3(%arg0: i32, %arg1: i32) -> (i32, i32) {
    %c0_i32 = arith.constant 0 : i32
    %c0_i32_0 = arith.constant 0 : i32
    return %arg0, %c0_i32 : i32, i32
  }
}

</mosaic_0001>

<bundles_post_ra>
// kernel: tpu_custom_call.1
= control target key start
LH: loop header
LB: loop body
LE: loop exit
PB: predicated region body
PF: predicated region fallthrough
CT: control target
= control target key end

     0   :  { %8 = vsyncpa [#allocation4], 0  ;;  %s387_s0 = inlined_call_operand.hbm [shape: f32[8,4,256], index: 0, kind: input, shape index: {}]   ;;  %s388_s1 = inlined_call_operand.hbm [shape: f32[4,128], index: 1, kind: input, shape index: {}]   ;;  %s389_s2 = inlined_call_operand.vmem [shape: f32[1,128], index: 2, kind: input, shape index: {}]   ;;  %s390_s3 = inlined_call_operand.hbm [shape: f32[8,128], index: 3, kind: output, shape index: {}]  }
   0x1   :  { %9 = vsyncpa [#allocation7], 0 }
   0x2   :  { %10 = vsyncpa [#allocation5], 0  ;;  %s15_s14 = sshll.u32 %s387_s0, 4  ;;  %s329_s15 = smov [#allocation3]   ;;  %s16_s14 = int_to_ptr.hbm [resolvable:$true] %s15_s14 }
   0x3   :  { %s17_s16 = sshll.u32 %s329_s15, 4  ;;  %s29_s19 = sshll.u32 %s388_s1, 4  ;;  %s18_s16 = int_to_ptr.vmem [resolvable:$true] %s17_s16  ;;  %s30_s19 = int_to_ptr.hbm [resolvable:$true] %s29_s19 }
   0x4   :  { %s330_s20 = smov 128   ;;  %s331_s21 = smov 8  }
   0x5   :  { %23 = dma.hbm_to_vmem [thread:$0]  %s16_s14, 1024, %s18_s16, [#allocation4], %s330_s20, %s330_s20, %s331_s21  }
   0x6   :  { %s332_s22 = smov [#allocation6]  }
   0x7   :  { %s31_s23 = sshll.u32 %s332_s22, 4  ;;  %s32_s23 = int_to_ptr.vmem [resolvable:$true] %s31_s23 }
   0x8   :  { %34 = dma.hbm_to_vmem [thread:$0]  %s30_s19, 64, %s32_s23, [#allocation7]  }
   0x9   :  { %323 = dma.done.wait [#allocation4], 1024  }
   0xa   :  { %324 = vsyncadd [#allocation4], 4294966272 }
   0xb   :  { %325 = dma.done.wait [#allocation7], 64  }
   0xc   :  { %326 = vsyncadd [#allocation7], 4294967232  ;;  %v52_v0 = vld [vmem:[#allocation3] sm:$0xff]  ;;  %v54_v1 = vld [vmem:[#allocation3 + $0x10] sm:$0xff]  ;;  %vm111_vm0 = vcmask 1043456   ;;  %vm49_vm1 = vcmask 31744   ;;  %v160_v51 = vlaneseq }
   0xd   :  { %68 = vst [vmem:[#allocation1] ss:$2 sm:$0xff] %v52_v0  ;;  %v53_v2 = vld [vmem:[#allocation3 + $0x8] sm:$0xff]  ;;  %v55_v3 = vld [vmem:[#allocation3 + $0x18] sm:$0xff]  ;;  %v56_v4 = vld [vmem:[#allocation3 + $0x20] sm:$0xff]  ;;  %v333_v48 = vmov 0.0  }
   0xe   :  { %76 = vst [vmem:[#allocation1 + $0x20] ss:$2 sm:$0xff] %v54_v1  ;;  %v58_v5 = vld [vmem:[#allocation3 + $0x30] sm:$0xff]  ;;  %v57_v10 = vld [vmem:[#allocation3 + $0x28] sm:$0xff]  ;;  %v59_v16 = vld [vmem:[#allocation3 + $0x38] sm:$0xff]  ;;  %v161_v53 = vand.u32 127, %v160_v51 }
   0xf   :  { %72 = vst [vmem:[#allocation1 + $0x10] ss:$2 sm:$0xff] %v53_v2  ;;  %v192_v49 = vld [vmem:[#allocation6] sm:$0xf]  ;;  %vm170_vm2 = vcmask 1041409   ;;  %vm172_vm3 = vcmask 1042434  }
  0x10   :  { %80 = vst [vmem:[#allocation1 + $0x30] ss:$2 sm:$0xff] %v55_v3  ;;  %242 = vmatpush.msk.msra.mxu0 %vm111_vm0, %v192_v49  ;;  %vm174_vm4 = vcmask 1043459   ;;  %vm176_vm5 = vcmask 1044484   ;;  %vm178_vm6 = vcmask 1045509   ;;  %vm180_vm7 = vcmask 1046534  }
  0x11   :  { %50 = vst.msk [vmem:[#allocation2] sm:$0xff] %vm49_vm1, %v333_v48  ;;  %vm182_vm8 = vcmask 1047559   ;;  %s334_s24 = smov [#allocation8]   ;;  %s231_s28 = sshll.u32 %s390_s3, 4  ;;  %s232_s28 = int_to_ptr.hbm [resolvable:$true] %s231_s28 }
  0x12   :  { %s229_s25 = sshll.u32 %s334_s24, 4  ;;  %s230_s25 = int_to_ptr.vmem [resolvable:$true] %s229_s25 }
  0x14   :  { %v69_v6 = vld.sshfl [vmem:[#allocation1] sm:$0xff pattern:$0x75316420]  ;;  %v70_v7 = vld.sshfl [vmem:[#allocation1 + $0x8] sm:$0xff pattern:$0x75316420] }
  0x15   :  { %v112_v8 = vsel %vm111_vm0, %v69_v6, 0.0  ;;  %v113_v9 = vsel %vm111_vm0, %v70_v7, 0.0  ;;  %83 = vst [vmem:[#allocation1] ss:$2 sm:$0xff] %v56_v4 }
  0x16   :  { %v114_v11 = vadd.f32 %v113_v9, %v112_v8  ;;  %v77_v12 = vld.sshfl [vmem:[#allocation1 + $0x20] sm:$0xff pattern:$0x75316420]  ;;  %v78_v13 = vld.sshfl [vmem:[#allocation1 + $0x28] sm:$0xff pattern:$0x75316420] }
  0x17   :  { %v122_v14 = vsel %vm111_vm0, %v77_v12, 0.0  ;;  %v123_v15 = vsel %vm111_vm0, %v78_v13, 0.0  ;;  %89 = vst [vmem:[#allocation1 + $0x20] ss:$2 sm:$0xff] %v58_v5 }
  0x18   :  { %115 = vadd.xlane.f32.xlu0 %v114_v11  ;;  %v124_v17 = vadd.f32 %v123_v15, %v122_v14  ;;  %v73_v18 = vld.sshfl [vmem:[#allocation1 + $0x10] sm:$0xff pattern:$0x75316420]  ;;  %v74_v19 = vld.sshfl [vmem:[#allocation1 + $0x18] sm:$0xff pattern:$0x75316420] }
  0x19   :  { %86 = vst [vmem:[#allocation1 + $0x10] ss:$2 sm:$0xff] %v57_v10  ;;  %v117_v20 = vsel %vm111_vm0, %v73_v18, 0.0  ;;  %v118_v21 = vsel %vm111_vm0, %v74_v19, 0.0  ;;  %v51_v9 = vld [vmem:[#allocation2] sm:$0xff] }
  0x1a   :  { %125 = vadd.xlane.f32.xlu1 %v124_v17  ;;  %v81_v22 = vld.sshfl [vmem:[#allocation1 + $0x30] sm:$0xff pattern:$0x75316420]  ;;  %v82_v23 = vld.sshfl [vmem:[#allocation1 + $0x38] sm:$0xff pattern:$0x75316420]  ;;  %v119_v26 = vadd.f32 %v118_v21, %v117_v20 }
  0x1b   :  { %92 = vst [vmem:[#allocation1 + $0x30] ss:$2 sm:$0xff] %v59_v16  ;;  %v127_v24 = vsel %vm111_vm0, %v81_v22, 0.0  ;;  %v128_v25 = vsel %vm111_vm0, %v82_v23, 0.0  ;;  %v250_v14 = vld [vmem:[%s389_s2] ss:$0 sm:$0xff] }
  0x1c   :  { %v84_v27 = vld.sshfl [vmem:[#allocation1] sm:$0xff pattern:$0x75316420]  ;;  %v85_v28 = vld.sshfl [vmem:[#allocation1 + $0x8] sm:$0xff pattern:$0x75316420]  ;;  %v129_v32 = vadd.f32 %v128_v25, %v127_v24 }
  0x1d   :  { %v132_v29 = vsel %vm111_vm0, %v84_v27, 0.0  ;;  %v133_v30 = vsel %vm111_vm0, %v85_v28, 0.0 }
  0x1e   :  { %v134_v31 = vadd.f32 %v133_v30, %v132_v29  ;;  %v90_v33 = vld.sshfl [vmem:[#allocation1 + $0x20] sm:$0xff pattern:$0x75316420]  ;;  %v91_v34 = vld.sshfl [vmem:[#allocation1 + $0x28] sm:$0xff pattern:$0x75316420] }
  0x1f   :  { %v142_v39 = vsel %vm111_vm0, %v90_v33, 0.0  ;;  %v143_v40 = vsel %vm111_vm0, %v91_v34, 0.0 }
  0x20   :  { %120 = vadd.xlane.f32.xlu0 %v119_v26  ;;  %135 = vadd.xlane.f32.xlu2 %v134_v31  ;;  %v87_v35 = vld.sshfl [vmem:[#allocation1 + $0x10] sm:$0xff pattern:$0x75316420]  ;;  %v88_v36 = vld.sshfl [vmem:[#allocation1 + $0x18] sm:$0xff pattern:$0x75316420]  ;;  %v144_v46 = vadd.f32 %v143_v40, %v142_v39 }
  0x21   :  { %v137_v37 = vsel %vm111_vm0, %v87_v35, 0.0  ;;  %v138_v38 = vsel %vm111_vm0, %v88_v36, 0.0 }
  0x22   :  { %130 = vadd.xlane.f32.xlu1 %v129_v32  ;;  %v93_v41 = vld.sshfl [vmem:[#allocation1 + $0x30] sm:$0xff pattern:$0x75316420]  ;;  %v94_v42 = vld.sshfl [vmem:[#allocation1 + $0x38] sm:$0xff pattern:$0x75316420]  ;;  %v139_v45 = vadd.f32 %v138_v38, %v137_v37 }
  0x23   :  { %v147_v43 = vsel %vm111_vm0, %v93_v41, 0.0  ;;  %v148_v44 = vsel %vm111_vm0, %v94_v42, 0.0 }
  0x24   :  { %v149_v47 = vadd.f32 %v148_v44, %v147_v43 }
  0x28   :  { %140 = vadd.xlane.f32.xlu2 %v139_v45  ;;  %145 = vadd.xlane.f32.xlu0 %v144_v46 }
  0x2a   :  { %150 = vadd.xlane.f32.xlu1 %v149_v47 }
  0x8b   :  { %v116_v50 = vpop.xlane.xlu0 %115 }
  0x8c   :  { %v162_v56 = vperm.slane %v116_v50, %v161_v53 }
  0x8d   :  { %v126_v52 = vpop.xlane.xlu1 %125 }
  0x8e   :  { %v164_v58 = vperm.slane %v126_v52, %v161_v53 }
  0x93   :  { %v121_v54 = vpop.xlane.xlu0 %120  ;;  %v136_v55 = vpop.xlane.xlu2 %135 }
  0x94   :  { %v163_v57 = vperm.slane %v121_v54, %v161_v53  ;;  %v166_v0 = vperm.slane %v136_v55, %v161_v53 }
  0x95   :  { %v131_v59 = vpop.xlane.xlu1 %130 }
  0x96   :  { %v171_v60 = vsel %vm170_vm2, %v163_v57, %v162_v56  ;;  %v165_v61 = vperm.slane %v131_v59, %v161_v53 }
  0x97   :  { %v173_v62 = vsel %vm172_vm3, %v164_v58, %v171_v60 }
  0x98   :  { %v175_v63 = vsel %vm174_vm4, %v165_v61, %v173_v62 }
  0x99   :  { %v177_v5 = vsel %vm176_vm5, %v166_v0, %v175_v63 }
  0x9b   :  { %v141_v1 = vpop.xlane.xlu2 %140  ;;  %v146_v2 = vpop.xlane.xlu0 %145 }
  0x9c   :  { %v167_v3 = vperm.slane %v141_v1, %v161_v53  ;;  %v168_v4 = vperm.slane %v146_v2, %v161_v53 }
  0x9d   :  { %v151_v6 = vpop.xlane.xlu1 %150 }
  0x9e   :  { %v179_v7 = vsel %vm178_vm6, %v167_v3, %v177_v5  ;;  %v169_v8 = vperm.slane %v151_v6, %v161_v53 }
  0x9f   :  { %v181_v10 = vsel %vm180_vm7, %v168_v4, %v179_v7 }
  0xa0   :  { %v183_v11 = vsel %vm182_vm8, %v169_v8, %v181_v10 }
  0xa1   :  { %v185_v12 = vadd.f32 %v183_v11, %v51_v9 }
  0xa3   :  { %187 = vst.msk [vmem:[#allocation2] sm:$0xff] %vm49_vm1, %v185_v12 }
  0xaa   :  { %v191_v13 = vld [vmem:[#allocation2] sm:$0xff] }
  0xab   :  { %243 = vmatmul.msk.f32.vlgmr.msra.gmra.mxu0 %vm49_vm1, %v191_v13 }
 0x128   :  { %v220_v15 = vpop.f32.mrf.mxu0 }
 0x129   :  { %v221_v16 = vadd.f32 %v250_v14, %v220_v15 }
 0x12b   :  { %223 = vst [vmem:[#allocation8] sm:$0xff] %v221_v16 }
 0x12c   :  { %234 = dma.vmem_to_hbm [thread:$0]  %s230_s25, 128, %s232_s28, [#allocation5]  }
 0x12d   :  { %327 = dma.done.wait [#allocation5], 128  }
 0x12e   :  { %328 = vsyncadd [#allocation5], 4294967168 }
 0x12f   :  { %239 = vsyncpa [#allocation4], 1 }
 0x130   :  { %240 = vsyncpa [#allocation7], 1 }
 0x131   :  { %241 = vsyncpa [#allocation5], 1 }

</bundles_post_ra>
